<compile_context>
chip_gen: v7x
topology: tpu7x:2x2x1
jax: 0.10.0
libtpu: 0.0.40
codegen_flags: <defaults>
</compile_context>

<pallas_src>
import functools

import jax
import jax.numpy as jnp
from jax.experimental import pallas as pl
from jax.experimental.pallas import tpu as pltpu


# --------------------------------------------------------------------------
# Small planning helpers
# --------------------------------------------------------------------------
def _cdiv(a, b):
    return -(-a // b)


def _round_down(x, m):
    return (x // m) * m


def _vmem_capacity_bytes():
    """Physical VMEM per TensorCore (generation-aware), with a safe fallback."""
    try:
        return int(pltpu.get_tpu_info().vmem_capacity_bytes)
    except Exception:
        return 64 << 20          # conservative: v7x per-TC VMEM


def _sublane_multiple(dtype):
    """Sublane packing for the dtype: 8 (f32), 16 (bf16), 32 (int8/fp8)."""
    itemsize = jnp.dtype(dtype).itemsize
    return 8 * max(1, 4 // max(1, itemsize))


def _plan_fast(n, c_flat, pad_flat, itemsize, sub, budget):
    """Pick (tn, tc, nd, ncol) tiles for the lane-dense fast path."""
    # ~4 MiB per-step output tile on v7x (32 MiB budget), ~8 MiB on v5e/v6e.
    target_tile = max(1 << 20, min(16 << 20, budget // 8))
    total_out = n * (c_flat + pad_flat) * itemsize
    big = total_out > (4 << 20)

    # Column (lane) tile: a multiple of 128 dividing c_flat, small enough that
    # double-buffered in+out tiles with `sub` rows stay inside the VMEM budget.
    tc_cap = min(c_flat,
                 max(128, budget // (4 * sub * itemsize)),
                 max(128, target_tile // (sub * itemsize)))
    if big and n <= sub:
        # Only the column axis can provide pipeline / megacore steps here.
        tc_cap = min(tc_cap, max(128, c_flat // 8))
    m = c_flat // 128
    q = 1
    for cand in range(max(1, min(m, tc_cap // 128)), 0, -1):
        if m % cand == 0:
            q = cand
            break
    tc = q * 128

    nd = c_flat // tc                  # data column blocks (exact cover)
    npad = _cdiv(pad_flat, tc)         # zero column blocks (last may be partial)
    ncol = nd + npad

    # Row (sublane) tile: multiple of the dtype's sublane packing.
    if n <= sub:
        tn = n
    else:
        tn = min(budget // (4 * tc * itemsize),
                 max(1, target_tile // (tc * itemsize)))
        if big:
            # >= ~8 grid steps for software pipelining and >= 2 row blocks so
            # the parallel row axis can shard across v7x's two TensorCores.
            tn = min(tn, _cdiv(n, max(2, _cdiv(8, ncol))))
        tn = max(sub, _round_down(tn, sub))
        if tn >= n:
            tn = n
    return tn, tc, nd, ncol


def _plan_fallback(n, c, c_out, hw, itemsize, budget):
    """Rows per block for the per-channel fallback (tn is a leading block dim)."""
    target_tile = max(1 << 20, min(16 << 20, budget // 8))
    row_bytes = (c + c_out) * hw * itemsize          # in+out per row, per buffer
    tn = min(n,
             max(1, budget // (2 * row_bytes)),
             max(1, target_tile // max(1, c_out * hw * itemsize)))
    if n * c_out * hw * itemsize > (4 << 20):
        tn = min(tn, max(1, _cdiv(n, 8)))            # keep >= ~8 grid steps
    return max(1, tn)


# --------------------------------------------------------------------------
# Kernels
# --------------------------------------------------------------------------
def _copy_or_zero_kernel(num_data_blocks, x_ref, o_ref):
    """Column block j < num_data_blocks copies the input; else writes zeros."""
    j = pl.program_id(1)

    @pl.when(j < num_data_blocks)
    def _():
        o_ref[...] = x_ref[...]

    @pl.when(j >= num_data_blocks)
    def _():
        o_ref[...] = jnp.zeros_like(o_ref)


def _channel_split_kernel(c, pad_size, hw, tn, x_ref, o_ref):
    """Fallback: copy the C data channels, zero only the trailing pad channels."""
    o_ref[:, :c, :] = x_ref[...]
    o_ref[:, c:, :] = jnp.zeros((tn, pad_size, hw), dtype=o_ref.dtype)


# --------------------------------------------------------------------------
# pallas_call wrappers
# --------------------------------------------------------------------------
def _injective_pad_flat(x2, c_flat, pad_flat, itemsize, sub, budget):
    n = x2.shape[0]
    o_flat = c_flat + pad_flat
    tn, tc, nd, ncol = _plan_fast(n, c_flat, pad_flat, itemsize, sub, budget)

    def in_index(i, j):
        # Pad column blocks reuse the last data block index: the pipeline sees
        # an unchanged block index on consecutive steps and skips the re-fetch,
        # so the zero region costs no extra HBM reads.
        return (i, jnp.minimum(j, nd - 1))

    # 2x double-buffered input + output tiles, plus slack; set the limit to the
    # actual need (never clamp below it).
    vmem_need = 4 * tn * tc * itemsize + (4 << 20)

    return pl.pallas_call(
        functools.partial(_copy_or_zero_kernel, nd),
        out_shape=jax.ShapeDtypeStruct((n, o_flat), x2.dtype),
        grid=(_cdiv(n, tn), ncol),
        in_specs=[pl.BlockSpec((tn, tc), in_index)],
        out_specs=pl.BlockSpec((tn, tc), lambda i, j: (i, j)),
        compiler_params=pltpu.CompilerParams(
            dimension_semantics=("parallel", "parallel"),
            vmem_limit_bytes=int(max(16 << 20, vmem_need)),
        ),
        cost_estimate=pl.CostEstimate(
            flops=0, transcendentals=0,
            bytes_accessed=n * (c_flat + o_flat) * itemsize),
    )(x2)


def _injective_pad_channels(x3, pad_size, itemsize, budget):
    n, c, hw = x3.shape
    c_out = c + pad_size
    tn = _plan_fallback(n, c, c_out, hw, itemsize, budget)
    vmem_need = 2 * tn * (c + c_out) * hw * itemsize + (4 << 20)

    return pl.pallas_call(
        functools.partial(_channel_split_kernel, c, pad_size, hw, tn),
        out_shape=jax.ShapeDtypeStruct((n, c_out, hw), x3.dtype),
        grid=(_cdiv(n, tn),),
        in_specs=[pl.BlockSpec((tn, c, hw), lambda i: (i, 0, 0))],
        out_specs=pl.BlockSpec((tn, c_out, hw), lambda i: (i, 0, 0)),
        compiler_params=pltpu.CompilerParams(
            dimension_semantics=("parallel",),
            vmem_limit_bytes=int(max(16 << 20, vmem_need)),
        ),
        cost_estimate=pl.CostEstimate(
            flops=0, transcendentals=0,
            bytes_accessed=n * (c + c_out) * hw * itemsize),
    )(x3)


def injective_pad(x, pad_size):
    """Pallas equivalent of injective_pad.forward: (N,C,H,W) -> (N,C+pad,H,W)."""
    n, c, h, w = x.shape
    if pad_size == 0:                       # degenerate: nothing to pad
        return x
    hw = h * w
    c_flat, pad_flat = c * hw, pad_size * hw
    itemsize = jnp.dtype(x.dtype).itemsize
    sub = _sublane_multiple(x.dtype)
    budget = max(8 << 20, _vmem_capacity_bytes() // 2)   # generation-aware

    if c_flat % 128 == 0:
        # Fast path: lane-dense flattened rows; data/pad split on a 128-multiple
        # column-block boundary -> unmasked full-tile stores everywhere.
        out2 = _injective_pad_flat(x.reshape(n, c_flat), c_flat, pad_flat,
                                   itemsize, sub, budget)
        return out2.reshape(n, c + pad_size, h, w)

    # Lane-unaligned split: keep channels as a separate (sublane) axis so the
    # data/pad boundary never slices the lane dimension.
    out3 = _injective_pad_channels(x.reshape(n, c, hw), pad_size, itemsize, budget)
    return out3.reshape(n, c + pad_size, h, w)


def injective_pad_inverse(x, pad_size):
    """Inverse: drop the trailing `pad_size` channels (plain JAX glue)."""
    return x[:, : x.shape[1] - pad_size, :, :]


if __name__ == "__main__":
    key_main, key_fb = jax.random.split(jax.random.PRNGKey(0))

    # Primary (lane-aligned) shapes consistent with the module.
    N, C, H, W = 2, 4, 16, 16
    pad_size = 3
    x = jax.random.normal(key_main, (N, C, H, W), dtype=jnp.float32)

    out = jax.block_until_ready(injective_pad(x, pad_size))
    ref = jnp.pad(x, ((0, 0), (0, pad_size), (0, 0), (0, 0)))
    assert out.shape == (N, C + pad_size, H, W), out.shape
    assert out.dtype == x.dtype
    assert jnp.allclose(out, ref), "mismatch vs reference (fast path)"

    # Round trip through the inverse recovers the input.
    assert jnp.allclose(injective_pad_inverse(out, pad_size), x)

    # pad_size == 0 degenerate case.
    assert jnp.allclose(injective_pad(x, 0), x)

    # Lane-unaligned shapes (C*H*W % 128 != 0) take the channel-block fallback.
    y = jax.random.normal(key_fb, (2, 3, 8, 8), dtype=jnp.float32)
    out_y = jax.block_until_ready(injective_pad(y, 5))
    ref_y = jnp.pad(y, ((0, 0), (0, 5), (0, 0), (0, 0)))
    assert jnp.allclose(out_y, ref_y), "mismatch vs reference (fallback path)"

    print("KERNEL_OK")
</pallas_src>

<mosaic_0001>
module attributes {stable_mosaic.version = 11 : i64} {
  func.func @_copy_or_zero_kernel(%arg0: i32, %arg1: i32, %arg2: memref<2x1024xf32, #tpu.memory_space<vmem>>, %arg3: memref<2x1024xf32, #tpu.memory_space<vmem>>) attributes {dimension_semantics = [#tpu.dimension_semantics<parallel>, #tpu.dimension_semantics<parallel>], iteration_bounds = array<i64: 1, 2>, scalar_prefetch = 0 : i64, scratch_operands = 0 : i64, tpu.core_type = #tpu.core_type<tc>, window_params = [{transform_indices = @transform_0, window_bounds = array<i64: 2, 1024>}, {transform_indices = @transform_1, window_bounds = array<i64: 2, 1024>}]} {
    %c1_i32 = arith.constant 1 : i32
    %0 = arith.cmpi slt, %arg1, %c1_i32 : i32
    %1 = arith.extui %0 : i1 to i32
    %c0_i32 = arith.constant 0 : i32
    %2 = arith.cmpi ne, %1, %c0_i32 : i32
    scf.if %2 {
      %c0 = arith.constant 0 : index
      %c0_2 = arith.constant 0 : index
      %6 = vector.load %arg2[%c0, %c0_2] : memref<2x1024xf32, #tpu.memory_space<vmem>>, vector<2x1024xf32>
      %c0_3 = arith.constant 0 : index
      %c0_4 = arith.constant 0 : index
      %7 = vector.load %arg3[%c0_3, %c0_4] : memref<2x1024xf32, #tpu.memory_space<vmem>>, vector<2x1024xf32>
      tpu.vector_store %arg3[%c0_3, %c0_4], %6 {strides = array<i32>} : memref<2x1024xf32, #tpu.memory_space<vmem>>, vector<2x1024xf32>,
    } else {
    }
    %c1_i32_0 = arith.constant 1 : i32
    %3 = arith.cmpi sge, %arg1, %c1_i32_0 : i32
    %4 = arith.extui %3 : i1 to i32
    %c0_i32_1 = arith.constant 0 : i32
    %5 = arith.cmpi ne, %4, %c0_i32_1 : i32
    scf.if %5 {
      %cst = arith.constant 0.000000e+00 : f32
      %6 = vector.broadcast %cst : f32 to vector<2x1024xf32>
      %c0 = arith.constant 0 : index
      %c0_2 = arith.constant 0 : index
      %7 = vector.load %arg3[%c0, %c0_2] : memref<2x1024xf32, #tpu.memory_space<vmem>>, vector<2x1024xf32>
      tpu.vector_store %arg3[%c0, %c0_2], %6 {strides = array<i32>} : memref<2x1024xf32, #tpu.memory_space<vmem>>, vector<2x1024xf32>,
    } else {
    }
    return
  }
  func.func @transform_0(%arg0: i32, %arg1: i32) -> (i32, i32) {
    %c0_i32 = arith.constant 0 : i32
    %0 = arith.minsi %arg1, %c0_i32 : i32
    %c0_i32_0 = arith.constant 0 : i32
    return %arg0, %0 : i32, i32
  }
  func.func @transform_1(%arg0: i32, %arg1: i32) -> (i32, i32) {
    %c0_i32 = arith.constant 0 : i32
    return %arg0, %arg1 : i32, i32
  }
}

</mosaic_0001>

<bundles_post_ra>
// kernel: tpu_custom_call.1
= control target key start
LH: loop header
LB: loop body
LE: loop exit
PB: predicated region body
PF: predicated region fallthrough
CT: control target
= control target key end

     0   :  { %6 = vsyncpa [#allocation3], 0  ;;  %s718_s0 = inlined_call_operand.hbm [shape: f32[2,1024], index: 0, kind: input, shape index: {}]   ;;  %s719_s1 = inlined_call_operand.hbm [shape: f32[2,1792], index: 1, kind: output, shape index: {}]  }
   0x1   :  { %8 = vsyncpa [#allocation3 + $0x1], 0 }
   0x2   :  { %9 = vsyncpa [#allocation4], 0 }
   0x3   :  { %11 = vsyncpa [#allocation4 + $0x1], 0  ;;  %s543_s6 = smov 0   ;;  %s545_s7 = smov 0  }
   0x4   :  { %s547_s8 = smov 0   ;;  %s549_s9 = smov 0  }
   0x5   :  { %s551_s10 = smov 0   ;;  %s553_s11 = smov 0  }
   0x6   :  { %s555_s12 = smov 0   ;;  %s557_s13 = smov 0  }
   0x7 LB: > { %s286_s14 = sadd.s32 4294967295, %s528_s13   ;;  %s287_s15 = sadd.s32 4294967294, %s528_s13   ;;  %s528_s13 = sphi %s557_s13, %s17_s13   ;;  %s524_s12 = sphi %s555_s12, %s739_s12   ;;  %s520_s11 = sphi %s553_s11, %s738_s11   ;;  %s516_s10 = sphi %s551_s10, %s708_s10   ;;  %s512_s9 = sphi %s549_s9, %s737_s9   ;;  %s508_s8 = sphi %s547_s8, %s736_s8   ;;  %s504_s7 = sphi %s545_s7, %s735_s7   ;;  %s500_s6 = sphi %s543_s6, %s734_s6  }
   0x8   : > { %s26_s16 = sadd.s32 1, %s524_s12  ;;  %p497_p1 = scmp.ne.s32.totalorder %s516_s10, 0 }
   0x9   : > { %p27_p0 = scmp.ge.s32.totalorder %s26_s16, 2  ;;  %p50_p2 = scmp.eq.s32.totalorder %s528_s13, 0 }
   0xa   : > { %p55_p3 = scmp.ne.s32.totalorder %s516_s10, %s512_s9  ;;  %p56_p5 = scmp.eq.s32.totalorder %s286_s14, 0 }
   0xb   : > { %s741_s16 = smov (%p27_p0, %s26_s16), 0  ;;  %p589_p4 = por %p497_p1, %p50_p2 }
   0xc   : > { %p593_p6 = por %p56_p5, %p55_p3  ;;  %s66_s19 = ssub.s32 %s524_s12, %s741_s16 }
   0xd   : > { %p68_p7 = scmp.eq.s32.totalorder %s66_s19, 0  ;;  %s70_s20 = sadd.s32 1, %s508_s8 }
   0xe   : > { %s723_s18 = scalar_select %p593_p6, 1, 0 }
   0xf   : > { %s601_s21 = scalar_select %p68_p7, %s508_s8, %s70_s20  }
  0x10   : > { %p80_p8 = scmp.ne.s32.totalorder %s508_s8, %s504_s7  ;;  %p81_p9 = scmp.eq.s32.totalorder %s286_s14, 1 }
  0x11   : > { %p86_p10 = scmp.ne.s32.totalorder %s504_s7, %s500_s6  ;;  %p87_p11 = scmp.eq.s32.totalorder %s287_s15, 1 }
  0x12   : > { %p607_p12 = por %p81_p9, %p80_p8  ;;  %p320_p1 = scmp.lt.s32.totalorder %s528_s13, 2 }
  0x13   : > { %p612_p0 = por %p87_p11, %p86_p10  ;;  %s530_s24 = smov [#allocation2]  }
  0x14   : > { %s724_s22 = scalar_select %p607_p12, 1, 0 }
  0x15   : > { %s725_s23 = scalar_select %p612_p0, 1, 0 }
  0x16   : > { %s123_s25 = sshll.u32 %s530_s24, 4  ;;  %p619_p2 = pnand %p320_p1, %p589_p4  ;;  %s124_s25 = int_to_ptr.vmem [resolvable:$true] %s123_s25 }
  0x17   : > { %s395_s29 = scalar_lea.hbm %s718_s0, 256 }
  0x18   : > { %s726_s26 = scalar_select %p619_p2, 1, 0 }
  0x19   : > { %p396_p7 = scmp.ne.s32.totalorder %s718_s0, %s395_s29  ;;  %p397_p8 = pneg %p619_p2 }
  0x1a   : > { %p402_p4 = scmp.lt.u32.totalorder %s395_s29, %s395_s29  ;;  %p404_p11 = scmp.lt.u32.totalorder %s395_s29, %s718_s0 }
  0x1b   : > { %p398_p9 = pnand %p397_p8, %p396_p7 }
  0x1c   : > { %p405_p1 = por %p404_p11, %p402_p4 }
  0x1d   : > { %p399_p10 = pneg %p398_p9 }
  0x1f   : > { %p406_p13 = pnand %p405_p1, %p399_p10 }
  0x21   : > { %409 = shalt.err (!%p406_p13)
}
  0x22   : > { %s410_s5 = scalar_lea.vmem %s124_s25, 256  ;;  %s417_s9 = scalar_lea.vmem %s124_s25, 512 }
  0x23   : > { %p411_p3 = scmp.ne.s32.totalorder %s124_s25, %s410_s5  ;;  %p418_p12 = scmp.lt.s32.totalorder %s124_s25, %s124_s25 }
  0x24   : > { %p419_p6 = scmp.lt.s32.totalorder %s417_s9, %s410_s5 }
  0x25   : > { %p413_p5 = pnand %p411_p3, %p397_p8 }
  0x26   : > { %p420_p2 = por %p419_p6, %p418_p12 }
  0x27   : > { %p414_p0 = pneg %p413_p5 }
  0x29   : > { %p421_p7 = pnand %p420_p2, %p414_p0 }
  0x2b   : > { %424 = shalt.err (!%p421_p7)
}
  0x2c   : > { %p727_p9 = scmp.ne.s32.totalorder %s726_s26, 0  ;;  %p728_p10 = scmp.lt.s32.totalorder %s528_s13, 3 }
  0x2d   : > { %p729_p13 = scmp.ge.s32.totalorder %s528_s13, 1 }
  0x2e   : > { %315 = dma.hbm_to_vmem [thread:$0]  (!%p727_p9), %s718_s0, 256, %s124_s25, [#allocation3]  }
  0x2f   : > { %p129_p4 = pnand %p729_p13, %p728_p10 }
  0x30   : > { %s134_s17 = sand.u32 (!%p129_p4), 1, %s516_s10   ;;  %p730_p6 = scmp.ne.s32.totalorder (!%p129_p4), %s723_s18, 0 }
  0x31   : > { %132 = sbr.rel (%p129_p4) target bundleno = 111 (0x6f), region = 24  ;;  %s294_s19 = sshll.u32 (!%p129_p4), %s134_s17, 4 }
  0x32   : > { %s135_s20 = scalar_lea.sflag (!%p129_p4), [#allocation3], %s134_s17  ;;  %s138_s24 = scalar_lea.vmem (!%p129_p4), [#allocation2], %s294_s19 }
  0x38   : > { %490 = dma.done.wait (%p730_p6), %s135_s20, 256  }
  0x39   : > { %492 = vsyncadd (%p730_p6), %s135_s20, 4294967040  ;;  %s154_s26 = sand.u32 1, %s504_s7   ;;  %p296_p12 = scmp.ge.s32.totalorder %s520_s11, 1 }
  0x3a   : > { %s295_s27 = sshll.u32 %s154_s26, 4  ;;  %v169_v0 = vld [vmem:[%s138_s24] sm:$0xff] (!%p296_p12)  ;;  %v170_v1 = vld [vmem:[%s138_s24 + $0x8] sm:$0xff] (!%p296_p12) }
  0x3b   : > { %s156_s28 = scalar_lea.vmem [#allocation5], %s295_s27  ;;  %168 = sbr.rel (%p296_p12) target bundleno = 66 (0x42), region = 32 }
  0x3c   : > { %171 = vst [vmem:[%s156_s28] sm:$0xff] (!%p296_p12), %v169_v0  ;;  %172 = vst [vmem:[%s156_s28 + $0x8] sm:$0xff] (!%p296_p12), %v170_v1 }
  0x42 PF: > { %p297_p0 = scmp.lt.s32.totalorder %s520_s11, 1 }
  0x43   : > { %v531_v2 = vmov (!%p297_p0), 0.0  }
  0x44   : > { %176 = sbr.rel (%p297_p0) target bundleno = 75 (0x4b), region = 36  ;;  %177 = vst [vmem:[%s156_s28] sm:$0xff] (!%p297_p0), %v531_v2  ;;  %178 = vst [vmem:[%s156_s28 + $0x8] sm:$0xff] (!%p297_p0), %v531_v2 }
  0x4b PF: > { %s653_s18 = scalar_lea.sflag [#allocation4], %s154_s26  ;;  %p731_p2 = scmp.ne.s32.totalorder %s724_s22, 0 }
  0x4c   : > { %s299_s25 = sshll.u32 (%p731_p2), %s520_s11, 3 }
  0x4d   : > { %186 = sbr.rel (!%p731_p2) target bundleno = 111 (0x6f), region = 40  ;;  %s188_s29 = ssub.s32 (%p731_p2), 14, %s299_s25 }
  0x4e   : > { %p189_p3 = scmp.lt.s32.totalorder (%p731_p2), %s188_s29, 8 }
  0x54   : > { %s743_s29 = smov (!%p189_p3, %s188_s29), 8 }
  0x55   : > { %s658_s30 = sshll.u32 %s743_s29, 5 }
  0x56   : > { %s193_s2 = ssub.s32 256, %s658_s30 }
  0x57   : > { %194 = vsyncadd %s653_s18, %s193_s2  ;;  %p301_p5 = scmp.ne.s32.totalorder %s658_s30, 0  ;;  %s308_s3 = sshll.u32 %s520_s11, 8 }
  0x58   : > { %s667_s5 = scalar_lea.hbm %s719_s1, %s308_s3  ;;  %s202_s9 = sshll.u32 %s156_s28, 4  ;;  %s203_s9 = int_to_ptr.vmem [resolvable:$true] %s202_s9 }
  0x59   : > { %s425_s14 = scalar_lea.vmem %s203_s9, %s658_s30  ;;  %s532_s15 = smov [#allocation5]  }
  0x5a   : > { %p426_p8 = scmp.ne.s32.totalorder %s203_s9, %s425_s14  ;;  %s429_s17 = sshll.u32 %s532_s15, 4  ;;  %s430_s17 = int_to_ptr.vmem [resolvable:$false] %s429_s17 }
  0x5b   : > { %s431_s19 = scalar_lea.vmem %s430_s17, 512  ;;  %p432_p7 = scmp.lt.s32.totalorder %s203_s9, %s430_s17 }
  0x5c   : > { %p427_p11 = pnand %p426_p8, %p301_p5  ;;  %p433_p9 = scmp.lt.s32.totalorder %s431_s19, %s425_s14 }
  0x5e   : > { %p428_p1 = pneg %p427_p11  ;;  %p434_p10 = por %p433_p9, %p432_p7 }
  0x60   : > { %p435_p13 = pnand %p434_p10, %p428_p1 }
  0x62   : > { %438 = shalt.err (!%p435_p13)
}
  0x63   : > { %s439_s11 = scalar_lea.hbm %s667_s5, %s658_s30  ;;  %s443_s26 = scalar_lea.hbm %s719_s1, 448 }
  0x64   : > { %p440_p4 = scmp.ne.s32.totalorder %s667_s5, %s439_s11  ;;  %p444_p0 = scmp.lt.u32.totalorder %s667_s5, %s719_s1 }
  0x65   : > { %p445_p2 = scmp.lt.u32.totalorder %s443_s26, %s439_s11  ;;  %p447_p8 = scmp.lt.u32.totalorder %s439_s11, %s667_s5 }
  0x66   : > { %p441_p6 = pnand %p440_p4, %p301_p5 }
  0x67   : > { %p446_p3 = por %p445_p2, %p444_p0 }
  0x68   : > { %p442_p12 = pneg %p441_p6 }
  0x69   : > { %p448_p11 = por %p447_p8, %p446_p3 }
  0x6b   : > { %p449_p1 = pnand %p448_p11, %p442_p12 }
  0x6d   : > { %452 = shalt.err (!%p449_p1)
}
  0x6e   : > { %205 = dma.vmem_to_hbm [thread:$0]  (%p301_p5), %s203_s9, %s658_s30, %s667_s5, %s653_s18  }
  0x6f PF: > { %s214_s25 = sand.u32 1, %s500_s6   ;;  %p732_p7 = scmp.ne.s32.totalorder %s725_s23, 0 }
  0x70   : > { %p733_p9 = scmp.ge.s32.totalorder %s528_s13, 2  ;;  %s215_s29 = scalar_lea.sflag [#allocation4], %s214_s25 }
  0x72   : > { %p317_p10 = pnand %p733_p9, %p732_p7 }
  0x74   : > { %494 = dma.done.wait (!%p317_p10), %s215_s29, 256  }
  0x75   : > { %496 = vsyncadd (!%p317_p10), %s215_s29, 4294967040  ;;  %s17_s13 = sadd.s32 1, %s528_s13   ;;  %s734_s6 = smov %s504_s7 }
  0x76   : > { %p14_p13 = scmp.ge.s32.totalorder %s17_s13, 4   ;;  %s735_s7 = smov %s508_s8 }
  0x77   : > { %s736_s8 = smov %s601_s21  ;;  %s737_s9 = smov %s516_s10 }
  0x78   : > { %s708_s10 = smov 0   ;;  %s738_s11 = smov %s524_s12 }
  0x79   : > { %s739_s12 = smov %s741_s16  ;;  %16 = sbr.rel (!%p14_p13) target bundleno = 7 (0x7), region = 77 }
  0x80   :  { %220 = vsyncpa [#allocation3], 1 }
  0x81   :  { %222 = vsyncpa [#allocation3 + $0x1], 1 }
  0x82   :  { %223 = vsyncpa [#allocation4], 1 }
  0x83   :  { %225 = vsyncpa [#allocation4 + $0x1], 1 }

</bundles_post_ra>
